<compile_context>
chip_gen: v7x
topology: tpu7x:2x2x1
jax: 0.10.0
libtpu: 0.0.40
codegen_flags: <defaults>
</compile_context>

<pallas_src>
import functools

import jax
import jax.numpy as jnp
from jax.experimental import pallas as pl
from jax.experimental.pallas import tpu as pltpu


def _round_up(x, m):
    return (x + m - 1) // m * m


@functools.lru_cache(maxsize=1)
def _vmem_budget_bytes():
    """~70% of per-core VMEM (128 MiB v5e/v6e, 64 MiB v7x); safe fallback."""
    cap = 64 * 1024 * 1024
    try:
        detected = int(pltpu.get_tpu_info().vmem_capacity_bytes)
        if detected > 0:
            cap = detected
    except Exception:
        pass
    return int(cap * 0.70)


def _pick_block(nc, h_pad, w_pad, in_itemsize, vmem_budget):
    """Largest TB whose working set fits the budget, with >= 2 grid steps."""
    # Fixed: double-buffered bf16 band matrices + output blocks + margin.
    fixed = 2 * 2 * (h_pad * h_pad + w_pad * w_pad) + 2 * 8 * 128 * 4 + (2 << 20)
    # Per image: 2 double-buffered input blocks + ~12 live f32 (H, W) temps
    # (g, p, y, pooled, weit, e, ps, pw, gw, reduction products, partials).
    per_img = h_pad * w_pad * (2 * 2 * in_itemsize + 12 * 4)
    avail = max(vmem_budget - fixed, 0)
    tb = int(avail // per_img)
    tb = max(1, min(tb, 64))           # 64 caps the unrolled per-image H-pass
    if nc > 1:
        tb = max(1, min(tb, -(-nc // 2)))   # ceil(nc/2): >= 2 grid steps
    return tb


def _structure_loss_kernel(pred_ref, gt_ref, bh_ref, bw_ref, out_ref,
                           pooled_ref, *, valid_h, valid_w, num_valid):
    tb, hp, wp = gt_ref.shape

    p = pred_ref[...].astype(jnp.float32)            # (TB, H, W)
    g = gt_ref[...].astype(jnp.float32)
    g_bf = gt_ref[...].astype(jnp.bfloat16)

    # ---- separable 31x31 average pool of gt (bf16 MXU, f32 accumulation) ---
    # W-pass: one flat (TB*H, W) @ (W, W) matmul over the whole tile.
    y = jnp.dot(g_bf.reshape(tb * hp, wp), bw_ref[...],
                preferred_element_type=jnp.float32)
    y_bf = y.astype(jnp.bfloat16).reshape(tb, hp, wp)
    # H-pass: per-image (H, H) @ (H, W) into VMEM scratch; avoids a (TB, H, H)
    # broadcast of Bh and any transpose/relayout of the tile.
    bh = bh_ref[...]
    for b in range(tb):
        pooled_ref[b] = jnp.dot(bh, y_bf[b], preferred_element_type=jnp.float32)
    pooled = pooled_ref[...] * jnp.float32(1.0 / (31.0 * 31.0))

    weit = 1.0 + 5.0 * jnp.abs(pooled - g)

    # Padded rows/cols: every reduced quantity carries a weit factor, so
    # masking weit alone removes the padded region from all four sums.
    if (valid_h != hp) or (valid_w != wp):
        rows = jax.lax.broadcasted_iota(jnp.int32, (1, hp, wp), 1)
        cols = jax.lax.broadcasted_iota(jnp.int32, (1, hp, wp), 2)
        mask = jnp.where((rows < valid_h) & (cols < valid_w), 1.0, 0.0)
        weit = weit * mask

    # ---- BCE-with-logits + sigmoid sharing one exp(-|p|) per element -------
    e = jnp.exp(-jnp.abs(p))
    softplus = jnp.log(1.0 + e)        # argument in (1, 2]: well conditioned
    wbce_el = jnp.maximum(p, 0.0) - p * g + softplus
    r = 1.0 / (1.0 + e)
    ps = jnp.where(p >= 0.0, r, e * r)               # sigmoid(p), reuses e

    # ---- fused per-image weighted reductions: H (sublanes) then W (lanes) --
    def _sum_hw(x):                                  # (TB, H, W) -> (TB, 1)
        return jnp.sum(jnp.sum(x, axis=1), axis=1, keepdims=True)

    pw = ps * weit
    gw = g * weit
    weit_sum = _sum_hw(weit)
    wbce_num = _sum_hw(weit * wbce_el)
    inter = _sum_hw(pw * g)
    union = _sum_hw(pw + gw)

    wbce = wbce_num / weit_sum
    wiou = 1.0 - (inter + 1.0) / (union - inter + 1.0)
    per_image = wbce + wiou                          # (TB, 1)

    # Mask dummy images added to round N*C up to a multiple of TB.
    if num_valid % tb != 0:
        img = pl.program_id(0) * tb + jax.lax.broadcasted_iota(
            jnp.int32, (tb, 1), 0)
        per_image = per_image * jnp.where(img < num_valid, 1.0, 0.0)

    block_sum = jnp.sum(per_image)
    out_ref[...] = jnp.full(out_ref.shape, block_sum, dtype=out_ref.dtype)


@functools.partial(jax.jit, static_argnames=("block_images",))
def structure_loss(pred, gt, block_images=None):
    """pred, gt: (N, C, H, W); same semantics as the PyTorch StructureLoss."""
    n, c, h, w = pred.shape
    nc = n * c
    pred_f = pred.reshape(nc, h, w)      # keep input dtype (no DMA inflation)
    gt_f = gt.reshape(nc, h, w)

    # Spatial padding: H to a multiple of 8; W to a multiple of 128 when the
    # lane padding overhead is <= 25% (lane-dense vregs / unmasked stores).
    h_pad = _round_up(h, 8)
    w128 = _round_up(w, 128)
    w_pad = w128 if (w % 128 != 0 and (w128 - w) * 4 <= w) else w

    in_itemsize = max(pred.dtype.itemsize, gt.dtype.itemsize)
    tb = (block_images if block_images is not None
          else _pick_block(nc, h_pad, w_pad, in_itemsize, _vmem_budget_bytes()))
    nc_pad = _round_up(nc, tb)
    num_blocks = nc_pad // tb

    if (nc_pad, h_pad, w_pad) != (nc, h, w):
        pad = ((0, nc_pad - nc), (0, h_pad - h), (0, w_pad - w))
        pred_f = jnp.pad(pred_f, pad)
        gt_f = jnp.pad(gt_f, pad)

    # Exact 0/1 band matrices in bf16 (1/961 is applied in f32 in-kernel).
    ih = jnp.arange(h_pad)
    bh = (jnp.abs(ih[:, None] - ih[None, :]) <= 15).astype(jnp.bfloat16)
    iw = jnp.arange(w_pad)
    bw = (jnp.abs(iw[:, None] - iw[None, :]) <= 15).astype(jnp.bfloat16)

    kernel = functools.partial(_structure_loss_kernel,
                               valid_h=h, valid_w=w, num_valid=nc)

    partial_sums = pl.pallas_call(
        kernel,
        out_shape=jax.ShapeDtypeStruct((num_blocks, 8, 128), jnp.float32),
        grid=(num_blocks,),
        in_specs=[
            pl.BlockSpec((tb, h_pad, w_pad), lambda i: (i, 0, 0)),   # pred
            pl.BlockSpec((tb, h_pad, w_pad), lambda i: (i, 0, 0)),   # gt
            pl.BlockSpec((h_pad, h_pad), lambda i: (0, 0)),          # Bh
            pl.BlockSpec((w_pad, w_pad), lambda i: (0, 0)),          # Bw
        ],
        out_specs=pl.BlockSpec((1, 8, 128), lambda i: (i, 0, 0)),
        scratch_shapes=[pltpu.VMEM((tb, h_pad, w_pad), jnp.float32)],
        compiler_params=pltpu.CompilerParams(
            dimension_semantics=("parallel",),
            vmem_limit_bytes=_vmem_budget_bytes()),
        cost_estimate=pl.CostEstimate(
            flops=2 * nc_pad * h_pad * w_pad * (h_pad + w_pad)
                  + 24 * nc_pad * h_pad * w_pad,
            transcendentals=2 * nc_pad * h_pad * w_pad,      # exp + log
            bytes_accessed=2 * in_itemsize * nc_pad * h_pad * w_pad
                           + 2 * (h_pad * h_pad + w_pad * w_pad)
                           + num_blocks * 8 * 128 * 4),
    )(pred_f, gt_f, bh, bw)

    return jnp.sum(partial_sums[:, 0, 0]) / nc


def _structure_loss_ref(pred, gt):
    """Pure-JAX (f32) reference mirroring the PyTorch forward."""
    pred = pred.astype(jnp.float32)
    gt = gt.astype(jnp.float32)
    pooled = jax.lax.reduce_window(
        gt, 0.0, jax.lax.add,
        window_dimensions=(1, 1, 31, 31),
        window_strides=(1, 1, 1, 1),
        padding=[(0, 0), (0, 0), (15, 15), (15, 15)]) / (31.0 * 31.0)
    weit = 1.0 + 5.0 * jnp.abs(pooled - gt)
    wbce_el = (jnp.maximum(pred, 0.0) - pred * gt
               + jnp.log1p(jnp.exp(-jnp.abs(pred))))
    wbce = (weit * wbce_el).sum(axis=(2, 3)) / weit.sum(axis=(2, 3))
    ps = jax.nn.sigmoid(pred)
    inter = (ps * gt * weit).sum(axis=(2, 3))
    union = ((ps + gt) * weit).sum(axis=(2, 3))
    wiou = 1.0 - (inter + 1.0) / (union - inter + 1.0)
    return (wbce + wiou).mean()


if __name__ == "__main__":
    key = jax.random.PRNGKey(0)
    kp, kg = jax.random.split(key)

    # Case 1: canonical small shape (nc=8 -> TB=4 -> 2 parallel grid steps).
    N, C, H, W = 2, 4, 16, 16
    pred = jax.random.normal(kp, (N, C, H, W), dtype=jnp.float32)
    gt = jax.random.uniform(kg, (N, C, H, W), dtype=jnp.float32)
    ref = _structure_loss_ref(pred, gt)

    loss = structure_loss(pred, gt)                     # auto-tiled path
    jax.block_until_ready(loss)
    assert jnp.allclose(loss, ref, rtol=5e-3, atol=1e-3), (loss, ref)

    loss_b2 = structure_loss(pred, gt, block_images=2)  # explicit TB path
    jax.block_until_ready(loss_b2)
    assert jnp.allclose(loss_b2, ref, rtol=5e-3, atol=1e-3), (loss_b2, ref)

    # Case 2: awkward shapes -- exercises H padding (20 -> 24) + spatial mask
    # and image padding (nc=3 -> 4) + per-image validity mask.
    kp2, kg2 = jax.random.split(jax.random.PRNGKey(0))
    pred2 = jax.random.normal(kp2, (1, 3, 20, 16), dtype=jnp.float32)
    gt2 = jax.random.uniform(kg2, (1, 3, 20, 16), dtype=jnp.float32)
    ref2 = _structure_loss_ref(pred2, gt2)
    loss2 = structure_loss(pred2, gt2)
    jax.block_until_ready(loss2)
    assert jnp.allclose(loss2, ref2, rtol=5e-3, atol=1e-3), (loss2, ref2)

    print("KERNEL_OK")
</pallas_src>

<mosaic_0001>
module attributes {stable_mosaic.version = 11 : i64} {
  func.func @_structure_loss_kernel(%arg0: i32, %arg1: memref<4x16x16xf32, #tpu.memory_space<vmem>>, %arg2: memref<4x16x16xf32, #tpu.memory_space<vmem>>, %arg3: memref<16x16xbf16, #tpu.memory_space<vmem>>, %arg4: memref<16x16xbf16, #tpu.memory_space<vmem>>, %arg5: memref<1x8x128xf32, #tpu.memory_space<vmem>>, %arg6: memref<4x16x16xf32, #tpu.memory_space<vmem>>) attributes {dimension_semantics = [#tpu.dimension_semantics<parallel>], iteration_bounds = array<i64: 2>, scalar_prefetch = 0 : i64, scratch_operands = 1 : i64, tpu.core_type = #tpu.core_type<tc>, window_params = [{transform_indices = @transform_0, window_bounds = array<i64: 4, 16, 16>}, {transform_indices = @transform_1, window_bounds = array<i64: 4, 16, 16>}, {pipeline_mode = #tpu.pipeline_mode<synchronous>, transform_indices = @transform_2, window_bounds = array<i64: 16, 16>}, {pipeline_mode = #tpu.pipeline_mode<synchronous>, transform_indices = @transform_3, window_bounds = array<i64: 16, 16>}, {transform_indices = @transform_4, window_bounds = array<i64: 1, 8, 128>}]} {
    %c0 = arith.constant 0 : index
    %c0_0 = arith.constant 0 : index
    %c0_1 = arith.constant 0 : index
    %0 = vector.load %arg1[%c0, %c0_0, %c0_1] : memref<4x16x16xf32, #tpu.memory_space<vmem>>, vector<4x16x16xf32>
    %c0_2 = arith.constant 0 : index
    %c0_3 = arith.constant 0 : index
    %c0_4 = arith.constant 0 : index
    %1 = vector.load %arg2[%c0_2, %c0_3, %c0_4] : memref<4x16x16xf32, #tpu.memory_space<vmem>>, vector<4x16x16xf32>
    %c0_5 = arith.constant 0 : index
    %c0_6 = arith.constant 0 : index
    %c0_7 = arith.constant 0 : index
    %2 = vector.load %arg2[%c0_5, %c0_6, %c0_7] : memref<4x16x16xf32, #tpu.memory_space<vmem>>, vector<4x16x16xf32>
    %3 = arith.truncf %2 : vector<4x16x16xf32> to vector<4x16x16xbf16>
    %4 = vector.shape_cast %3 : vector<4x16x16xbf16> to vector<64x16xbf16>
    %c0_8 = arith.constant 0 : index
    %c0_9 = arith.constant 0 : index
    %5 = vector.load %arg4[%c0_8, %c0_9] : memref<16x16xbf16, #tpu.memory_space<vmem>>, vector<16x16xbf16>
    %cst = arith.constant dense<0.000000e+00> : vector<64x16xf32>
    %6 = tpu.matmul %4, %5, %cst {dimension_numbers = #tpu.dot_dimension_numbers<[1], [0], [0], [1], [0, 0, 1, 1], [], []>} : vector<64x16xbf16>, vector<16x16xbf16>, vector<64x16xf32> -> vector<64x16xf32>
    %7 = arith.truncf %6 : vector<64x16xf32> to vector<64x16xbf16>
    %8 = vector.shape_cast %7 : vector<64x16xbf16> to vector<4x16x16xbf16>
    %c0_10 = arith.constant 0 : index
    %c0_11 = arith.constant 0 : index
    %9 = vector.load %arg3[%c0_10, %c0_11] : memref<16x16xbf16, #tpu.memory_space<vmem>>, vector<16x16xbf16>
    %10 = vector.extract_strided_slice %8 {offsets = [0, 0, 0], sizes = [1, 16, 16], strides = [1, 1, 1]} : vector<4x16x16xbf16> to vector<1x16x16xbf16>
    %11 = vector.shape_cast %10 : vector<1x16x16xbf16> to vector<16x16xbf16>
    %cst_12 = arith.constant dense<0.000000e+00> : vector<16x16xf32>
    %12 = tpu.matmul %9, %11, %cst_12 {dimension_numbers = #tpu.dot_dimension_numbers<[1], [0], [0], [1], [0, 0, 1, 1], [], []>} : vector<16x16xbf16>, vector<16x16xbf16>, vector<16x16xf32> -> vector<16x16xf32>
    %c0_13 = arith.constant 0 : index
    %c0_14 = arith.constant 0 : index
    %c0_15 = arith.constant 0 : index
    %13 = vector.load %arg6[%c0_13, %c0_14, %c0_15] : memref<4x16x16xf32, #tpu.memory_space<vmem>>, vector<1x16x16xf32>
    %14 = vector.shape_cast %13 : vector<1x16x16xf32> to vector<16x16xf32>
    %15 = vector.shape_cast %12 : vector<16x16xf32> to vector<1x16x16xf32>
    tpu.vector_store %arg6[%c0_13, %c0_14, %c0_15], %15 {strides = array<i32>} : memref<4x16x16xf32, #tpu.memory_space<vmem>>, vector<1x16x16xf32>,
    %16 = vector.extract_strided_slice %8 {offsets = [1, 0, 0], sizes = [1, 16, 16], strides = [1, 1, 1]} : vector<4x16x16xbf16> to vector<1x16x16xbf16>
    %17 = vector.shape_cast %16 : vector<1x16x16xbf16> to vector<16x16xbf16>
    %cst_16 = arith.constant dense<0.000000e+00> : vector<16x16xf32>
    %18 = tpu.matmul %9, %17, %cst_16 {dimension_numbers = #tpu.dot_dimension_numbers<[1], [0], [0], [1], [0, 0, 1, 1], [], []>} : vector<16x16xbf16>, vector<16x16xbf16>, vector<16x16xf32> -> vector<16x16xf32>
    %c1 = arith.constant 1 : index
    %c0_17 = arith.constant 0 : index
    %c0_18 = arith.constant 0 : index
    %19 = vector.load %arg6[%c1, %c0_17, %c0_18] : memref<4x16x16xf32, #tpu.memory_space<vmem>>, vector<1x16x16xf32>
    %20 = vector.shape_cast %19 : vector<1x16x16xf32> to vector<16x16xf32>
    %21 = vector.shape_cast %18 : vector<16x16xf32> to vector<1x16x16xf32>
    tpu.vector_store %arg6[%c1, %c0_17, %c0_18], %21 {strides = array<i32>} : memref<4x16x16xf32, #tpu.memory_space<vmem>>, vector<1x16x16xf32>,
    %22 = vector.extract_strided_slice %8 {offsets = [2, 0, 0], sizes = [1, 16, 16], strides = [1, 1, 1]} : vector<4x16x16xbf16> to vector<1x16x16xbf16>
    %23 = vector.shape_cast %22 : vector<1x16x16xbf16> to vector<16x16xbf16>
    %cst_19 = arith.constant dense<0.000000e+00> : vector<16x16xf32>
    %24 = tpu.matmul %9, %23, %cst_19 {dimension_numbers = #tpu.dot_dimension_numbers<[1], [0], [0], [1], [0, 0, 1, 1], [], []>} : vector<16x16xbf16>, vector<16x16xbf16>, vector<16x16xf32> -> vector<16x16xf32>
    %c2 = arith.constant 2 : index
    %c0_20 = arith.constant 0 : index
    %c0_21 = arith.constant 0 : index
    %25 = vector.load %arg6[%c2, %c0_20, %c0_21] : memref<4x16x16xf32, #tpu.memory_space<vmem>>, vector<1x16x16xf32>
    %26 = vector.shape_cast %25 : vector<1x16x16xf32> to vector<16x16xf32>
    %27 = vector.shape_cast %24 : vector<16x16xf32> to vector<1x16x16xf32>
    tpu.vector_store %arg6[%c2, %c0_20, %c0_21], %27 {strides = array<i32>} : memref<4x16x16xf32, #tpu.memory_space<vmem>>, vector<1x16x16xf32>,
    %28 = vector.extract_strided_slice %8 {offsets = [3, 0, 0], sizes = [1, 16, 16], strides = [1, 1, 1]} : vector<4x16x16xbf16> to vector<1x16x16xbf16>
    %29 = vector.shape_cast %28 : vector<1x16x16xbf16> to vector<16x16xbf16>
    %cst_22 = arith.constant dense<0.000000e+00> : vector<16x16xf32>
    %30 = tpu.matmul %9, %29, %cst_22 {dimension_numbers = #tpu.dot_dimension_numbers<[1], [0], [0], [1], [0, 0, 1, 1], [], []>} : vector<16x16xbf16>, vector<16x16xbf16>, vector<16x16xf32> -> vector<16x16xf32>
    %c3 = arith.constant 3 : index
    %c0_23 = arith.constant 0 : index
    %c0_24 = arith.constant 0 : index
    %31 = vector.load %arg6[%c3, %c0_23, %c0_24] : memref<4x16x16xf32, #tpu.memory_space<vmem>>, vector<1x16x16xf32>
    %32 = vector.shape_cast %31 : vector<1x16x16xf32> to vector<16x16xf32>
    %33 = vector.shape_cast %30 : vector<16x16xf32> to vector<1x16x16xf32>
    tpu.vector_store %arg6[%c3, %c0_23, %c0_24], %33 {strides = array<i32>} : memref<4x16x16xf32, #tpu.memory_space<vmem>>, vector<1x16x16xf32>,
    %c0_25 = arith.constant 0 : index
    %c0_26 = arith.constant 0 : index
    %c0_27 = arith.constant 0 : index
    %34 = vector.load %arg6[%c0_25, %c0_26, %c0_27] : memref<4x16x16xf32, #tpu.memory_space<vmem>>, vector<4x16x16xf32>
    %cst_28 = arith.constant 0.00104058278 : f32
    %35 = vector.broadcast %cst_28 : f32 to vector<4x16x16xf32>
    %36 = arith.mulf %34, %35 : vector<4x16x16xf32>
    %37 = arith.subf %36, %1 : vector<4x16x16xf32>
    %38 = math.absf %37 : vector<4x16x16xf32>
    %cst_29 = arith.constant 5.000000e+00 : f32
    %39 = vector.broadcast %cst_29 : f32 to vector<4x16x16xf32>
    %40 = arith.mulf %39, %38 : vector<4x16x16xf32>
    %cst_30 = arith.constant 1.000000e+00 : f32
    %41 = vector.broadcast %cst_30 : f32 to vector<4x16x16xf32>
    %42 = arith.addf %41, %40 : vector<4x16x16xf32>
    %43 = math.absf %0 : vector<4x16x16xf32>
    %cst_31 = arith.constant 0.000000e+00 : f32
    %44 = vector.broadcast %cst_31 : f32 to vector<4x16x16xf32>
    %45 = arith.subf %44, %43 : vector<4x16x16xf32>
    %46 = math.exp %45 : vector<4x16x16xf32>
    %cst_32 = arith.constant 1.000000e+00 : f32
    %47 = vector.broadcast %cst_32 : f32 to vector<4x16x16xf32>
    %48 = arith.addf %47, %46 : vector<4x16x16xf32>
    %49 = math.log %48 : vector<4x16x16xf32>
    %cst_33 = arith.constant 0.000000e+00 : f32
    %50 = vector.broadcast %cst_33 : f32 to vector<4x16x16xf32>
    %51 = arith.maximumf %0, %50 : vector<4x16x16xf32>
    %52 = arith.mulf %0, %1 : vector<4x16x16xf32>
    %53 = arith.subf %51, %52 : vector<4x16x16xf32>
    %54 = arith.addf %53, %49 : vector<4x16x16xf32>
    %cst_34 = arith.constant 1.000000e+00 : f32
    %55 = vector.broadcast %cst_34 : f32 to vector<4x16x16xf32>
    %56 = arith.addf %55, %46 : vector<4x16x16xf32>
    %cst_35 = arith.constant 1.000000e+00 : f32
    %57 = vector.broadcast %cst_35 : f32 to vector<4x16x16xf32>
    %58 = arith.divf %57, %56 : vector<4x16x16xf32>
    %cst_36 = arith.constant 0.000000e+00 : f32
    %59 = vector.broadcast %cst_36 : f32 to vector<4x16x16xf32>
    %60 = arith.cmpf oge, %0, %59 : vector<4x16x16xf32>
    %61 = arith.mulf %46, %58 : vector<4x16x16xf32>
    %62 = arith.select %60, %58, %61 : vector<4x16x16xi1>, vector<4x16x16xf32>
    %63 = arith.mulf %62, %42 : vector<4x16x16xf32>
    %64 = arith.mulf %1, %42 : vector<4x16x16xf32>
    %cst_37 = arith.constant dense<0.000000e+00> : vector<4x16xf32>
    %65 = vector.multi_reduction <add>, %42, %cst_37 [1] : vector<4x16x16xf32> to vector<4x16xf32>
    %cst_38 = arith.constant dense<0.000000e+00> : vector<4xf32>
    %66 = vector.multi_reduction <add>, %65, %cst_38 [1] : vector<4x16xf32> to vector<4xf32>
    %67 = vector.shape_cast %66 : vector<4xf32> to vector<4x1xf32>
    %68 = arith.mulf %42, %54 : vector<4x16x16xf32>
    %cst_39 = arith.constant dense<0.000000e+00> : vector<4x16xf32>
    %69 = vector.multi_reduction <add>, %68, %cst_39 [1] : vector<4x16x16xf32> to vector<4x16xf32>
    %cst_40 = arith.constant dense<0.000000e+00> : vector<4xf32>
    %70 = vector.multi_reduction <add>, %69, %cst_40 [1] : vector<4x16xf32> to vector<4xf32>
    %71 = vector.shape_cast %70 : vector<4xf32> to vector<4x1xf32>
    %72 = arith.mulf %63, %1 : vector<4x16x16xf32>
    %cst_41 = arith.constant dense<0.000000e+00> : vector<4x16xf32>
    %73 = vector.multi_reduction <add>, %72, %cst_41 [1] : vector<4x16x16xf32> to vector<4x16xf32>
    %cst_42 = arith.constant dense<0.000000e+00> : vector<4xf32>
    %74 = vector.multi_reduction <add>, %73, %cst_42 [1] : vector<4x16xf32> to vector<4xf32>
    %75 = vector.shape_cast %74 : vector<4xf32> to vector<4x1xf32>
    %76 = arith.addf %63, %64 : vector<4x16x16xf32>
    %cst_43 = arith.constant dense<0.000000e+00> : vector<4x16xf32>
    %77 = vector.multi_reduction <add>, %76, %cst_43 [1] : vector<4x16x16xf32> to vector<4x16xf32>
    %cst_44 = arith.constant dense<0.000000e+00> : vector<4xf32>
    %78 = vector.multi_reduction <add>, %77, %cst_44 [1] : vector<4x16xf32> to vector<4xf32>
    %79 = vector.shape_cast %78 : vector<4xf32> to vector<4x1xf32>
    %80 = arith.divf %71, %67 : vector<4x1xf32>
    %cst_45 = arith.constant 1.000000e+00 : f32
    %81 = vector.broadcast %cst_45 : f32 to vector<4x1xf32>
    %82 = arith.addf %75, %81 : vector<4x1xf32>
    %83 = arith.subf %79, %75 : vector<4x1xf32>
    %cst_46 = arith.constant 1.000000e+00 : f32
    %84 = vector.broadcast %cst_46 : f32 to vector<4x1xf32>
    %85 = arith.addf %83, %84 : vector<4x1xf32>
    %86 = arith.divf %82, %85 : vector<4x1xf32>
    %cst_47 = arith.constant 1.000000e+00 : f32
    %87 = vector.broadcast %cst_47 : f32 to vector<4x1xf32>
    %88 = arith.subf %87, %86 : vector<4x1xf32>
    %89 = arith.addf %80, %88 : vector<4x1xf32>
    %90 = vector.shape_cast %89 : vector<4x1xf32> to vector<1x4x1xf32>
    %cst_48 = arith.constant dense<0.000000e+00> : vector<1xf32>
    %91 = vector.multi_reduction <add>, %90, %cst_48 [1, 2] : vector<1x4x1xf32> to vector<1xf32>
    %92 = vector.shape_cast %91 : vector<1xf32> to vector<1x1x1xf32>
    %93 = vector.extract %92[0, 0, 0] : f32 from vector<1x1x1xf32>
    %94 = vector.broadcast %93 : f32 to vector<1x8x128xf32>
    %c0_49 = arith.constant 0 : index
    %c0_50 = arith.constant 0 : index
    %c0_51 = arith.constant 0 : index
    %95 = vector.load %arg5[%c0_49, %c0_50, %c0_51] : memref<1x8x128xf32, #tpu.memory_space<vmem>>, vector<1x8x128xf32>
    tpu.vector_store %arg5[%c0_49, %c0_50, %c0_51], %94 {strides = array<i32>} : memref<1x8x128xf32, #tpu.memory_space<vmem>>, vector<1x8x128xf32>,
    return
  }
  func.func @transform_0(%arg0: i32) -> (i32, i32, i32) {
    %c0_i32 = arith.constant 0 : i32
    %c0_i32_0 = arith.constant 0 : i32
    %c0_i32_1 = arith.constant 0 : i32
    return %arg0, %c0_i32, %c0_i32_0 : i32, i32, i32
  }
  func.func @transform_1(%arg0: i32) -> (i32, i32, i32) {
    %c0_i32 = arith.constant 0 : i32
    %c0_i32_0 = arith.constant 0 : i32
    %c0_i32_1 = arith.constant 0 : i32
    return %arg0, %c0_i32, %c0_i32_0 : i32, i32, i32
  }
  func.func @transform_2(%arg0: i32) -> (i32, i32) {
    %c0_i32 = arith.constant 0 : i32
    %c0_i32_0 = arith.constant 0 : i32
    %c0_i32_1 = arith.constant 0 : i32
    return %c0_i32, %c0_i32_0 : i32, i32
  }
  func.func @transform_3(%arg0: i32) -> (i32, i32) {
    %c0_i32 = arith.constant 0 : i32
    %c0_i32_0 = arith.constant 0 : i32
    %c0_i32_1 = arith.constant 0 : i32
    return %c0_i32, %c0_i32_0 : i32, i32
  }
  func.func @transform_4(%arg0: i32) -> (i32, i32, i32) {
    %c0_i32 = arith.constant 0 : i32
    %c0_i32_0 = arith.constant 0 : i32
    %c0_i32_1 = arith.constant 0 : i32
    return %arg0, %c0_i32, %c0_i32_0 : i32, i32, i32
  }
}

</mosaic_0001>

<bundles_post_ra>
// kernel: structure_loss.1
= control target key start
LH: loop header
LB: loop body
LE: loop exit
PB: predicated region body
PF: predicated region fallthrough
CT: control target
= control target key end

     0   :  { %9 = vsyncpa [#allocation4], 0  ;;  %s1935_s0 = inlined_call_operand.hbm [shape: f32[8,16,16], index: 0, kind: input, shape index: {}]   ;;  %s1936_s1 = inlined_call_operand.hbm [shape: f32[8,16,16], index: 1, kind: input, shape index: {}]   ;;  %s1937_s2 = inlined_call_operand.vmem [shape: bf16[16,16], index: 2, kind: input, shape index: {}, may-alias: {2,3}]   ;;  %s1938_s3 = inlined_call_operand.vmem [shape: bf16[16,16], index: 3, kind: input, shape index: {}, may-alias: {2,3}]   ;;  %s1939_s4 = inlined_call_operand.vmem [shape: f32[2,8,128], index: 4, kind: output, shape index: {}]  }
   0x1   :  { %11 = vsyncpa [#allocation4 + $0x1], 0 }
   0x2   :  { %12 = vsyncpa [#allocation6], 0 }
   0x3   :  { %14 = vsyncpa [#allocation6 + $0x1], 0  ;;  %s1387_s15 = smov 0   ;;  %s1389_s16 = smov 0  }
   0x4   :  { %s1391_s17 = smov 0   ;;  %s1393_s18 = smov 0  }
   0x5 LB: > { %s1406_s19 = sadd.s32 4294967295, %s1354_s18   ;;  %s1409_s20 = sadd.s32 1, %s1354_s18   ;;  %s1354_s18 = sphi %s1393_s18, %s1949_s18   ;;  %s1350_s17 = sphi %s1391_s17, %s1948_s17   ;;  %s1346_s16 = sphi %s1389_s16, %s1947_s16   ;;  %s1342_s15 = sphi %s1387_s15, %s1946_s15  }
   0x6   : > { %s24_s21 = ssub.s32 %s1354_s18, %s1409_s20  ;;  %s27_s22 = sadd.s32 1, %s1350_s17 }
   0x7   : > { %p25_p0 = scmp.eq.s32.totalorder %s24_s21, 0  ;;  %p34_p1 = scmp.ne.s32.totalorder %s1350_s17, %s1346_s16 }
   0x8   : > { %p35_p2 = scmp.eq.s32.totalorder %s1354_s18, 0  ;;  %p40_p3 = scmp.ne.s32.totalorder %s1346_s16, %s1342_s15 }
   0x9   : > { %s1419_s23 = scalar_select %p25_p0, %s1350_s17, %s27_s22  }
   0xa   : > { %p36_p4 = por %p35_p2, %p34_p1  ;;  %p41_p5 = scmp.eq.s32.totalorder %s1406_s19, 0 }
   0xb   : > { %p1165_p6 = scmp.lt.s32.totalorder %s1354_s18, 2  ;;  %s1428_s25 = sand.u32 1, %s1350_s17  }
   0xc   : > { %p1423_p7 = por %p41_p5, %p40_p3  ;;  %s1077_s26 = sshll.u32 %s1428_s25, 6 }
   0xd   : > { %s1102_s27 = sshll.u32 %s1354_s18, 10  ;;  %s168_s5 = scalar_lea.vmem [#allocation3], %s1077_s26 }
   0xe   : > { %s1941_s24 = scalar_select %p1423_p7, 1, 0 }
   0xf   : > { %s1437_s30 = scalar_lea.hbm %s1935_s0, %s1102_s27  ;;  %s176_s6 = sshll.u32 %s168_s5, 4  ;;  %s1441_s6 = int_to_ptr.vmem [resolvable:$true] %s176_s6 }
  0x10   : > { %p1443_p8 = pnand %p1165_p6, %p36_p4  ;;  %s165_s8 = scalar_lea.sflag [#allocation4], %s1428_s25 }
  0x11   : > { %s1256_s9 = scalar_lea.hbm %s1437_s30, 1024  ;;  %s1261_s12 = scalar_lea.hbm %s1935_s0, 2048 }
  0x12   : > { %p1257_p10 = scmp.ne.s32.totalorder %s1437_s30, %s1256_s9  ;;  %p1258_p11 = pneg %p1443_p8 }
  0x13   : > { %p1262_p0 = scmp.lt.u32.totalorder %s1437_s30, %s1935_s0  ;;  %p1263_p1 = scmp.lt.u32.totalorder %s1261_s12, %s1256_s9 }
  0x14   : > { %p1259_p12 = pnand %p1258_p11, %p1257_p10  ;;  %p1265_p3 = scmp.lt.u32.totalorder %s1256_s9, %s1437_s30 }
  0x15   : > { %p1264_p2 = por %p1263_p1, %p1262_p0 }
  0x16   : > { %p1260_p13 = pneg %p1259_p12 }
  0x17   : > { %p1266_p4 = por %p1265_p3, %p1264_p2 }
  0x19   : > { %p1267_p5 = pnand %p1266_p4, %p1260_p13 }
  0x1b   : > { %1270 = shalt.err (!%p1267_p5)
}
  0x1c   : > { %s1271_s15 = scalar_lea.vmem %s1441_s6, 1024  ;;  %s1356_s21 = smov [#allocation3]  }
  0x1d   : > { %p1272_p6 = scmp.ne.s32.totalorder %s1441_s6, %s1271_s15  ;;  %s1276_s22 = sshll.u32 %s1356_s21, 4  ;;  %s1277_s22 = int_to_ptr.vmem [resolvable:$false] %s1276_s22 }
  0x1e   : > { %s1278_s28 = scalar_lea.vmem %s1277_s22, 2048  ;;  %p1279_p9 = scmp.lt.s32.totalorder %s1441_s6, %s1277_s22 }
  0x1f   : > { %p1274_p10 = pnand %p1272_p6, %p1258_p11  ;;  %p1280_p0 = scmp.lt.s32.totalorder %s1278_s28, %s1271_s15 }
  0x21   : > { %p1275_p12 = pneg %p1274_p10  ;;  %p1281_p1 = por %p1280_p0, %p1279_p9 }
  0x23   : > { %p1282_p2 = pnand %p1281_p1, %p1275_p12 }
  0x25   : > { %1285 = shalt.err (!%p1282_p2)
}
  0x26   : > { %s1357_s29 = smov 128   ;;  %s1358_s5 = smov 8  }
  0x27   : > { %1161 = dma.hbm_to_vmem [thread:$0]  (!%p1443_p8), %s1437_s30, 1024, %s1441_s6, %s165_s8, %s1357_s29, %s1357_s29, %s1358_s5  }
  0x28   : > { %p206_p9 = scmp.lt.s32.totalorder %s1354_s18, 3  ;;  %s1485_s11 = scalar_lea.hbm %s1936_s1, %s1102_s27 }
  0x29   : > { %p1943_p13 = scmp.ge.s32.totalorder %s1354_s18, 1  ;;  %s190_s13 = scalar_lea.vmem [#allocation5], %s1077_s26 }
  0x2a   : > { %s198_s14 = sshll.u32 %s190_s13, 4  ;;  %s187_s30 = scalar_lea.sflag [#allocation6], %s1428_s25  ;;  %s1495_s14 = int_to_ptr.vmem [resolvable:$true] %s198_s14 }
  0x2b   : > { %p1489_p3 = pnand %p1943_p13, %p206_p9  ;;  %s1286_s6 = scalar_lea.hbm %s1485_s11, 1024 }
  0x2c   : > { %p1287_p4 = scmp.ne.s32.totalorder %s1485_s11, %s1286_s6  ;;  %s1291_s8 = scalar_lea.hbm %s1936_s1, 2048 }
  0x2d   : > { %p1292_p10 = scmp.lt.u32.totalorder %s1485_s11, %s1936_s1  ;;  %p1293_p12 = scmp.lt.u32.totalorder %s1291_s8, %s1286_s6 }
  0x2e   : > { %p1289_p5 = pnand %p1287_p4, %p1258_p11  ;;  %p1295_p1 = scmp.lt.u32.totalorder %s1286_s6, %s1485_s11 }
  0x2f   : > { %p1294_p0 = por %p1293_p12, %p1292_p10 }
  0x30   : > { %p1290_p6 = pneg %p1289_p5 }
  0x31   : > { %p1296_p2 = por %p1295_p1, %p1294_p0 }
  0x33   : > { %p1297_p9 = pnand %p1296_p2, %p1290_p6 }
  0x35   : > { %1300 = shalt.err (!%p1297_p9)
}
  0x36   : > { %s1301_s26 = scalar_lea.vmem %s1495_s14, 1024  ;;  %s1359_s22 = smov [#allocation5]  }
  0x37   : > { %p1302_p13 = scmp.ne.s32.totalorder %s1495_s14, %s1301_s26  ;;  %s1306_s28 = sshll.u32 %s1359_s22, 4  ;;  %s1307_s28 = int_to_ptr.vmem [resolvable:$false] %s1306_s28 }
  0x38   : > { %s1308_s9 = scalar_lea.vmem %s1307_s28, 2048  ;;  %p1309_p7 = scmp.lt.s32.totalorder %s1495_s14, %s1307_s28 }
  0x39   : > { %p1304_p4 = pnand %p1302_p13, %p1258_p11  ;;  %p1310_p10 = scmp.lt.s32.totalorder %s1308_s9, %s1301_s26 }
  0x3b   : > { %p1305_p5 = pneg %p1304_p4  ;;  %p1311_p12 = por %p1310_p10, %p1309_p7 }
  0x3d   : > { %p1312_p0 = pnand %p1311_p12, %p1305_p5 }
  0x3f   : > { %1315 = shalt.err (!%p1312_p0)
}
  0x40   : > { %1164 = dma.hbm_to_vmem [thread:$0]  (!%p1443_p8), %s1485_s11, 1024, %s1495_s14, %s187_s30, %s1357_s29, %s1357_s29, %s1358_s5  }
  0x41   : > { %210 = sbr.rel (%p1489_p3) target bundleno = 966 (0x3c6), region = 36  ;;  %s212_s10 = sand.u32 (!%p1489_p3), 1, %s1346_s16  }
  0x42   : > { %s1086_s13 = sshll.u32 (!%p1489_p3), %s212_s10, 6  ;;  %s213_s6 = scalar_lea.sflag (!%p1489_p3), [#allocation4], %s212_s10 }
  0x43   : > { %s1529_s18 = scalar_lea.vmem (!%p1489_p3), [#allocation3], %s1086_s13  ;;  %p1945_p7 = scmp.ne.s32.totalorder (!%p1489_p3), %s1941_s24, 0 }
  0x48   : > { %1333 = dma.done.wait (%p1945_p7), %s213_s6, 1024  }
  0x49   : > { %1335 = vsyncadd (%p1945_p7), %s213_s6, 4294966272  ;;  %s222_s25 = scalar_lea.sflag [#allocation6], %s212_s10  ;;  %s225_s7 = scalar_lea.vmem [#allocation5], %s1086_s13 }
  0x4a   : > { %1337 = dma.done.wait (%p1945_p7), %s222_s25, 1024  }
  0x4b   : > { %1339 = vsyncadd (%p1945_p7), %s222_s25, 4294966272  ;;  %v1202_v0 = vld [vmem:[%s1938_s3] sm:$0xff]   ;;  %v1544_v2 = vld [vmem:[%s225_s7 + $0x8] sm:$0xff]  ;;  %vm289_vm0 = vcmask 130048   ;;  %v1360_v13 = vmov 0.0   ;;  %vm1361_vm1 = vmmov 0  }
  0x4c   : > { %v1542_v1 = vld [vmem:[%s225_s7] sm:$0xff]  ;;  %1118 = vmatprep.subr.bf16.mxu0 %v1202_v0  ;;  %v1548_v4 = vld [vmem:[%s225_s7 + $0x10] sm:$0xff]  ;;  %v1550_v5 = vld [vmem:[%s225_s7 + $0x18] sm:$0xff]  ;;  %1128 = vmatprep.subr.bf16.mxu1 %v1360_v13  ;;  %vm788_vm10 = vcmask 1041409   ;;  %vm790_vm11 = vcmask 1042434   ;;  %vm792_vm12 = vcmask 1043459  }
  0x4d   : > { %1119 = vmatpush3.bf16.msra.mxu0 %v1202_v0  ;;  %v277_v3 = vpack.c.bf16 %v1544_v2, %v1542_v1  ;;  %v278_v6 = vpack.c.bf16 %v1550_v5, %v1548_v4  ;;  %v1555_v7 = vld [vmem:[%s225_s7 + $0x20] sm:$0xff]  ;;  %v1557_v8 = vld [vmem:[%s225_s7 + $0x28] sm:$0xff]  ;;  %v1562_v10 = vld [vmem:[%s225_s7 + $0x30] sm:$0xff]  ;;  %1130 = vmatprep.mubr.msk.bf16.mxu1 %vm1361_vm1, %v1360_v13  ;;  %vm795_vm13 = vcmask 125952   ;;  %vm973_vm14 = vcmask 3072   ;;  %p256_p8 = scmp.lt.s32.totalorder %s1406_s19, 1 }
  0x4e   : > { %v279_v9 = vpack.c.bf16 %v1557_v8, %v1555_v7  ;;  %v1564_v11 = vld [vmem:[%s225_s7 + $0x38] sm:$0xff]  ;;  %1140 = vmatprep.subr.bf16.mxu0 %v1360_v13  ;;  %v1203_v20 = vld [vmem:[%s1937_s2] sm:$0xff]   ;;  %v1585_v28 = vld [vmem:[%s1529_s18 + $0x8] sm:$0xff] }
  0x4f   : > { %1120 = vmatprep.mubr.msk.bf16.mxu0 %vm289_vm0, %v277_v3  ;;  %v280_v12 = vpack.c.bf16 %v1564_v11, %v1562_v10  ;;  %v1582_v27 = vld [vmem:[%s1529_s18] sm:$0xff]  ;;  %v605_v30 = vand.u32 2147483647, %v1585_v28  ;;  %v1590_v31 = vld [vmem:[%s1529_s18 + $0x10] sm:$0xff]  ;;  %v1593_v32 = vld [vmem:[%s1529_s18 + $0x18] sm:$0xff]  ;;  %vm709_vm3 = vcmp.ge.f32.partialorder %v1585_v28, 0.0 }
  0x50   : > { %1121 = vmatmul.mubr.msk.bf16.vlgmr.msra.gmra.mrb[0].mxu0 %vm289_vm0, %v278_v6  ;;  %v604_v29 = vand.u32 2147483647, %v1582_v27  ;;  %v1596_v33 = vld [vmem:[%s1529_s18 + $0x20] sm:$0xff]  ;;  %v606_v35 = vand.u32 2147483647, %v1590_v31  ;;  %v1600_v36 = vld [vmem:[%s1529_s18 + $0x28] sm:$0xff] }
  0x51   : > { %1124 = vmatprep.mubr.msk.bf16.mxu0 %vm289_vm0, %v279_v9  ;;  %v613_v37 = vsub.f32 0.0, %v605_v30  ;;  %v607_v38 = vand.u32 2147483647, %v1593_v32  ;;  %v608_v39 = vand.u32 2147483647, %v1596_v33  ;;  %v1605_v40 = vld [vmem:[%s1529_s18 + $0x30] sm:$0xff] }
  0x52   : > { %v612_v34 = vsub.f32 0.0, %v604_v29  ;;  %v609_v41 = vand.u32 2147483647, %v1600_v36  ;;  %v614_v43 = vsub.f32 0.0, %v606_v35  ;;  %v1609_v44 = vld [vmem:[%s1529_s18 + $0x38] sm:$0xff]  ;;  %v662_v29 = vmax.f32 %v1590_v31, 0.0 }
  0x53   : > { %v622_v45 = vmul.f32 1.442695, %v613_v37  ;;  %v615_v46 = vsub.f32 0.0, %v607_v38  ;;  %v610_v47 = vand.u32 2147483647, %v1605_v40  ;;  %v616_v48 = vsub.f32 0.0, %v608_v39 }
  0x54   : > { %v620_v42 = vmul.f32 1.442695, %v612_v34  ;;  %v617_v49 = vsub.f32 0.0, %v609_v41  ;;  %v611_v50 = vand.u32 2147483647, %v1609_v44  ;;  %v663_v34 = vmax.f32 %v1593_v32, 0.0 }
  0x55   : > { %v624_v51 = vmul.f32 1.442695, %v614_v43  ;;  %v626_v52 = vmul.f32 1.442695, %v615_v46  ;;  %v618_v53 = vsub.f32 0.0, %v610_v47  ;;  %v670_v35 = vmul.f32 %v1548_v4, %v1590_v31  ;;  %s1951_s19 = smov (!%p256_p8, %s1406_s19), 1 }
  0x56   : > { %1204 = vpow2.f32 %v620_v42  ;;  %v628_v54 = vmul.f32 1.442695, %v616_v48  ;;  %v630_v55 = vmul.f32 1.442695, %v617_v49  ;;  %v619_v56 = vsub.f32 0.0, %v611_v50  ;;  %s1088_s12 = sshll.u32 %s1951_s19, 3 }
  0x57   : > { %1206 = vpow2.f32 %v622_v45  ;;  %v632_v57 = vmul.f32 1.442695, %v618_v53  ;;  %v671_v37 = vmul.f32 %v1550_v5, %v1593_v32  ;;  %vm708_vm2 = vcmp.ge.f32.partialorder %v1582_v27, 0.0  ;;  %s259_s27 = scalar_lea.vmem %s1939_s4, %s1088_s12 }
  0x58   : > { %1125 = vmatmul.mubr.msk.bf16.gmra.mrb[4].mxu0 %vm289_vm0, %v280_v12  ;;  %1208 = vpow2.f32 %v624_v51  ;;  %v634_v58 = vmul.f32 1.442695, %v619_v56  ;;  %v1651_v53 = vsub.f32 %v662_v29, %v670_v35  ;;  %vm710_vm4 = vcmp.ge.f32.partialorder %v1590_v31, 0.0 }
  0x59   : > { %1142 = vmatprep.mubr.msk.bf16.mxu0 %vm1361_vm1, %v1360_v13  ;;  %1210 = vpow2.f32 %v626_v52  ;;  %vm711_vm5 = vcmp.ge.f32.partialorder %v1593_v32, 0.0  ;;  %vm712_vm6 = vcmp.ge.f32.partialorder %v1596_v33, 0.0  ;;  %vm713_vm7 = vcmp.ge.f32.partialorder %v1600_v36, 0.0 }
  0x5a   : > { %1212 = vpow2.f32 %v628_v54  ;;  %v1653_v54 = vsub.f32 %v663_v34, %v671_v37  ;;  %vm714_vm8 = vcmp.ge.f32.partialorder %v1605_v40, 0.0  ;;  %vm715_vm9 = vcmp.ge.f32.partialorder %v1609_v44, 0.0 }
  0x5b   : > { %1214 = vpow2.f32 %v630_v55 }
  0x5c   : > { %1216 = vpow2.f32 %v632_v57 }
  0x5d   : > { %1218 = vpow2.f32 %v634_v58  ;;  %v672_v58 = vmul.f32 %v1555_v7, %v1596_v33 }
  0x60   : > { %v1205_v59 = vpop.eup %1204 }
  0x61   : > { %v1613_v60 = vpop.eup %1206  ;;  %v636_v61 = vadd.f32 1.0, %v1205_v59 }
  0x62   : > { %v1209_v62 = vpop.eup %1208  ;;  %v637_v63 = vadd.f32 1.0, %v1613_v60 }
  0x63   : > { %v1616_v0 = vpop.eup %1210  ;;  %1220 = vlog2.f32 %v636_v61  ;;  %v638_v9 = vadd.f32 1.0, %v1209_v62 }
  0x64   : > { %v1618_v3 = vpop.eup %1212  ;;  %1222 = vlog2.f32 %v637_v63  ;;  %v639_v12 = vadd.f32 1.0, %v1616_v0 }
  0x65   : > { %v1620_v6 = vpop.eup %1214  ;;  %1224 = vrcp.f32 %v636_v61  ;;  %v673_v61 = vmul.f32 %v1557_v8, %v1600_v36 }
  0x66   : > { %1226 = vrcp.f32 %v637_v63  ;;  %v674_v63 = vmul.f32 %v1562_v10, %v1605_v40 }
  0x67   : > { %1228 = vrcp.f32 %v638_v9 }
  0x68   : > { %1230 = vrcp.f32 %v639_v12 }
 0x123   : > { %v1122_v14 = vpop.f32.mrb[0].mxu0 }
 0x124   : > { %v336_v15 = vpop.f32.mrb[1].mxu0 }
 0x125   : > { %v1123_v16 = vpop.f32.mrb[2].mxu0 }
 0x126   : > { %v368_v17 = vpack.c.bf16 %v1123_v16, %v1122_v14  ;;  %v339_v18 = vpop.f32.mrb[3].mxu0  ;;  %v640_v14 = vadd.f32 1.0, %v1618_v3 }
 0x127   : > { %v367_v19 = vpack.c.bf16 %v339_v18, %v336_v15  ;;  %v641_v15 = vadd.f32 1.0, %v1620_v6 }
 0x128   : > { %1232 = vrcp.f32 %v640_v14 }
 0x129   : > { %1129 = vmatpush3.bf16.msra.mxu1 %v367_v19  ;;  %1234 = vrcp.f32 %v641_v15 }
 0x12a   : > { %1134 = vmatprep.subr.bf16.mxu1 %v1360_v13  ;;  %1236 = vlog2.f32 %v638_v9 }
 0x12b   : > { %v1126_v21 = vpop.f32.mrb[4].mxu0 }
 0x12c   : > { %v352_v22 = vpop.f32.mrb[5].mxu0  ;;  %1131 = vmatmul.mubr.msk.bf16.vlgmr.msra.gmra.mrb[0].mxu1 %vm289_vm0, %v1203_v20 }
 0x12d   : > { %v1127_v23 = vpop.f32.mrb[6].mxu0  ;;  %1135 = vmatpush3.bf16.msra.mxu1 %v368_v17  ;;  %1136 = vmatprep.mubr.msk.bf16.mxu1 %vm1361_vm1, %v1360_v13 }
 0x12e   : > { %v370_v24 = vpack.c.bf16 %v1127_v23, %v1126_v21  ;;  %v355_v25 = vpop.f32.mrb[7].mxu0  ;;  %1146 = vmatprep.subr.bf16.mxu1 %v1360_v13  ;;  %v660_v21 = vmax.f32 %v1582_v27, 0.0  ;;  %v661_v23 = vmax.f32 %v1585_v28, 0.0 }
 0x12f   : > { %v369_v26 = vpack.c.bf16 %v355_v25, %v352_v22  ;;  %v669_v25 = vmul.f32 %v1544_v2, %v1585_v28 }
 0x131   : > { %1141 = vmatpush3.bf16.msra.mxu0 %v369_v26  ;;  %v677_v47 = vsub.f32 %v661_v23, %v669_v25 }
 0x134   : > { %1137 = vmatmul.mubr.msk.bf16.vlgmr.msra.gmra.mrb[4].mxu1 %vm289_vm0, %v1203_v20  ;;  %1143 = vmatmul.mubr.msk.bf16.vlgmr.msra.gmra.mrb[8].mxu0 %vm289_vm0, %v1203_v20 }
 0x135   : > { %1147 = vmatpush3.bf16.msra.mxu1 %v370_v24  ;;  %1148 = vmatprep.mubr.msk.bf16.mxu1 %vm1361_vm1, %v1360_v13  ;;  %v1623_v13 = vpop.eup %1216  ;;  %v668_v24 = vmul.f32 %v1542_v1, %v1582_v27 }
 0x136   : > { %v1627_v16 = vpop.eup %1218  ;;  %v642_v17 = vadd.f32 1.0, %v1623_v13 }
 0x137   : > { %v643_v18 = vadd.f32 1.0, %v1627_v16  ;;  %v1221_v19 = vpop.eup %1220  ;;  %v676_v46 = vsub.f32 %v660_v21, %v668_v24 }
 0x138   : > { %1238 = vrcp.f32 %v642_v17  ;;  %v645_v43 = vmul.f32 0.6931472, %v1221_v19 }
 0x139   : > { %1240 = vlog2.f32 %v639_v12 }
 0x13a   : > { %1242 = vrcp.f32 %v643_v18  ;;  %v1665_v9 = vadd.f32 %v676_v46, %v645_v43  ;;  %v666_v43 = vmax.f32 %v1605_v40, 0.0 }
 0x13b   : > { %1244 = vlog2.f32 %v640_v14 }
 0x13c   : > { %1149 = vmatmul.mubr.msk.bf16.vlgmr.msra.gmra.mrb[8].mxu1 %vm289_vm0, %v1203_v20  ;;  %v1223_v20 = vpop.eup %1222  ;;  %1246 = vlog2.f32 %v641_v15 }
 0x13d   : > { %v1225_v22 = vpop.eup %1224  ;;  %1248 = vlog2.f32 %v642_v17  ;;  %v647_v45 = vmul.f32 0.6931472, %v1223_v20  ;;  %v664_v17 = vmax.f32 %v1596_v33, 0.0 }
 0x13e   : > { %v1227_v26 = vpop.eup %1226  ;;  %1250 = vlog2.f32 %v643_v18  ;;  %v716_v51 = vmul.f32 %v1225_v22, %v1205_v59  ;;  %v665_v18 = vmax.f32 %v1600_v36, 0.0 }
 0x13f   : > { %v1229_v30 = vpop.eup %1228  ;;  %v717_v55 = vmul.f32 %v1227_v26, %v1613_v60  ;;  %v1667_v12 = vadd.f32 %v677_v47, %v647_v45  ;;  %v675_v60 = vmul.f32 %v1564_v11, %v1609_v44  ;;  %v667_v45 = vmax.f32 %v1609_v44, 0.0 }
 0x140   : > { %v1231_v39 = vpop.eup %1230  ;;  %v718_v56 = vmul.f32 %v1229_v30, %v1209_v62  ;;  %v1675_v15 = vsel %vm708_vm2, %v1225_v22, %v716_v51 }
 0x141   : > { %v1644_v42 = vpop.eup %1232  ;;  %v719_v62 = vmul.f32 %v1231_v39, %v1616_v0  ;;  %v1683_v0 = vsel %vm709_vm3, %v1227_v26, %v717_v55 }
 0x142   : > { %v1646_v49 = vpop.eup %1234  ;;  %v1687_v27 = vsel %vm710_vm4, %v1229_v30, %v718_v56  ;;  %v720_v34 = vmul.f32 %v1644_v42, %v1618_v3 }
 0x143   : > { %v1237_v52 = vpop.eup %1236  ;;  %v721_v28 = vmul.f32 %v1646_v49, %v1620_v6 }
 0x144   : > { %v1656_v57 = vpop.eup %1238  ;;  %v649_v26 = vmul.f32 0.6931472, %v1237_v52 }
 0x145   : > { %v1241_v59 = vpop.eup %1240 }
 0x146   : > { %v1243_v14 = vpop.eup %1242  ;;  %v1730_v33 = vadd.f32 %v1651_v53, %v649_v26 }
 0x147   : > { %v1245_v19 = vpop.eup %1244  ;;  %v723_v32 = vmul.f32 %v1243_v14, %v1627_v16  ;;  %v1718_v16 = vsel %vm713_vm7, %v1646_v49, %v721_v28 }
 0x148   : > { %v1247_v22 = vpop.eup %1246  ;;  %v653_v55 = vmul.f32 0.6931472, %v1245_v19 }
 0x149   : > { %v1249_v35 = vpop.eup %1248  ;;  %v655_v56 = vmul.f32 0.6931472, %v1247_v22 }
 0x14a   : > { %v1251_v3 = vpop.eup %1250 }
 0x1ff   : > { %v415_v38 = vpop.f32.mrb[0].mxu1 }
 0x200   : > { %422 = vst.msk [vmem:[#allocation2] sm:$0xff] %vm289_vm0, %v415_v38  ;;  %v1132_v41 = vpop.f32.mrb[1].mxu1  ;;  %v722_v38 = vmul.f32 %v1656_v57, %v1623_v13  ;;  %v681_v13 = vsub.f32 %v665_v18, %v673_v61 }
 0x201   : > { %v418_v48 = vpop.f32.mrb[2].mxu1  ;;  %v1699_v41 = vsel %vm711_vm5, %v1231_v39, %v719_v62  ;;  %v651_v39 = vmul.f32 0.6931472, %v1241_v59  ;;  %v657_v62 = vmul.f32 0.6931472, %v1249_v35 }
 0x202   : > { %423 = vst.msk [vmem:[#allocation2 + $0x8] sm:$0xff] %vm289_vm0, %v418_v48  ;;  %v1133_v50 = vpop.f32.mrb[3].mxu1 }
 0x203   : > { %v680_v50 = vsub.f32 %v664_v17, %v672_v58  ;;  %v1713_v58 = vsel %vm712_vm6, %v1644_v42, %v720_v34  ;;  %v1733_v42 = vadd.f32 %v1653_v54, %v651_v39 }
 0x205   : > { %v1736_v22 = vadd.f32 %v680_v50, %v653_v55 }
 0x207   : > { %v458_v20 = vpop.f32.mrb[4].mxu1  ;;  %v502_v21 = vpop.f32.mrb[8].mxu0  ;;  %v556_v23 = vld [vmem:[#allocation2] sm:$0xff] }
 0x208   : > { %466 = vst.msk [vmem:[#allocation2 + $0x10] sm:$0xff] %vm289_vm0, %v458_v20  ;;  %v1138_v24 = vpop.f32.mrb[5].mxu1  ;;  %510 = vst.msk [vmem:[#allocation2 + $0x20] sm:$0xff] %vm289_vm0, %v502_v21  ;;  %v1144_v25 = vpop.f32.mrb[9].mxu0  ;;  %v564_v29 = vmul.f32 0.0010405828, %v556_v23  ;;  %v682_v21 = vsub.f32 %v666_v43, %v674_v63  ;;  %v683_v23 = vsub.f32 %v667_v45, %v675_v60  ;;  %v1723_v63 = vsel %vm714_vm8, %v1656_v57, %v722_v38 }
 0x209   : > { %v461_v37 = vpop.f32.mrb[6].mxu1  ;;  %v505_v31 = vpop.f32.mrb[10].mxu0  ;;  %v557_v30 = vld [vmem:[#allocation2 + $0x8] sm:$0xff]  ;;  %v659_v20 = vmul.f32 0.6931472, %v1251_v3  ;;  %v1727_v60 = vsel %vm715_vm9, %v1243_v14, %v723_v32  ;;  %v1740_v14 = vadd.f32 %v681_v13, %v655_v56 }
 0x20a   : > { %467 = vst.msk [vmem:[#allocation2 + $0x18] sm:$0xff] %vm289_vm0, %v461_v37  ;;  %511 = vst.msk [vmem:[#allocation2 + $0x28] sm:$0xff] %vm289_vm0, %v505_v31  ;;  %v1139_v6 = vpop.f32.mrb[7].mxu1  ;;  %v1145_v46 = vpop.f32.mrb[11].mxu0  ;;  %v565_v47 = vmul.f32 0.0010405828, %v557_v30  ;;  %v572_v48 = vsub.f32 %v564_v29, %v1542_v1  ;;  %v1742_v53 = vadd.f32 %v682_v21, %v657_v62 }
 0x20b   : > { %v1744_v34 = vadd.f32 %v683_v23, %v659_v20 }
 0x20c   : > { %v573_v51 = vsub.f32 %v565_v47, %v1544_v2  ;;  %v580_v52 = vand.u32 2147483647, %v572_v48 }
 0x20e   : > { %v581_v24 = vand.u32 2147483647, %v573_v51  ;;  %v588_v25 = vmul.f32 5.0, %v580_v52 }
 0x20f   : > { %v546_v61 = vpop.f32.mrb[8].mxu1  ;;  %v558_v59 = vld [vmem:[#allocation2 + $0x10] sm:$0xff]  ;;  %v560_v17 = vld [vmem:[#allocation2 + $0x20] sm:$0xff] }
 0x210   : > { %554 = vst.msk [vmem:[#allocation2 + $0x30] sm:$0xff] %vm289_vm0, %v546_v61  ;;  %v1150_v36 = vpop.f32.mrb[9].mxu1  ;;  %v566_v49 = vmul.f32 0.0010405828, %v558_v59  ;;  %v568_v18 = vmul.f32 0.0010405828, %v560_v17 }
 0x211   : > { %v589_v19 = vmul.f32 5.0, %v581_v24  ;;  %v549_v40 = vpop.f32.mrb[10].mxu1  ;;  %v559_v57 = vld [vmem:[#allocation2 + $0x18] sm:$0xff]  ;;  %v561_v29 = vld [vmem:[#allocation2 + $0x28] sm:$0xff]  ;;  %v1738_v44 = vadd.f32 1.0, %v588_v25 }
 0x212   : > { %555 = vst.msk [vmem:[#allocation2 + $0x38] sm:$0xff] %vm289_vm0, %v549_v40  ;;  %v1151_v54 = vpop.f32.mrb[11].mxu1  ;;  %v567_v28 = vmul.f32 0.0010405828, %v559_v57  ;;  %v569_v26 = vmul.f32 0.0010405828, %v561_v29  ;;  %v574_v35 = vsub.f32 %v566_v49, %v1548_v4  ;;  %v576_v37 = vsub.f32 %v568_v18, %v1555_v7 }
 0x213   : > { %v1749_v31 = vadd.f32 1.0, %v589_v19  ;;  %v748_v30 = vsel %vm289_vm0, %v1738_v44, 0.0  ;;  %v1755_v38 = vmul.f32 %v1675_v15, %v1738_v44  ;;  %v799_v43 = vmul.f32 %v1665_v9, %v1738_v44 }
 0x214   : > { %v575_v45 = vsub.f32 %v567_v28, %v1550_v5  ;;  %v577_v3 = vsub.f32 %v569_v26, %v1557_v8  ;;  %v582_v6 = vand.u32 2147483647, %v574_v35  ;;  %v584_v46 = vand.u32 2147483647, %v576_v37 }
 0x215   : > { %v749_v47 = vsel %vm289_vm0, %v1749_v31, 0.0  ;;  %v1765_v48 = vmul.f32 %v1683_v0, %v1749_v31  ;;  %v854_v15 = vmul.f32 %v1755_v38, %v1542_v1  ;;  %v800_v50 = vmul.f32 %v1667_v12, %v1749_v31 }
 0x216   : > { %v583_v9 = vand.u32 2147483647, %v575_v45  ;;  %v585_v13 = vand.u32 2147483647, %v577_v3  ;;  %v590_v32 = vmul.f32 5.0, %v582_v6  ;;  %v592_v39 = vmul.f32 5.0, %v584_v46 }
 0x217   : > { %v562_v51 = vld [vmem:[#allocation2 + $0x30] sm:$0xff]  ;;  %v750_v52 = vadd.f32 %v749_v47, %v748_v30  ;;  %v855_v55 = vmul.f32 %v1765_v48, %v1544_v2  ;;  %v862_v56 = vsel %vm289_vm0, %v854_v15, 0.0  ;;  %v1775_v0 = vsel %vm289_vm0, %v799_v43, 0.0 }
 0x218   : > { %v570_v62 = vmul.f32 0.0010405828, %v562_v51  ;;  %v591_v20 = vmul.f32 5.0, %v583_v9  ;;  %v593_v21 = vmul.f32 5.0, %v585_v13  ;;  %v1777_v23 = vadd.f32 1.0, %v590_v32 }
 0x219   : > { %v563_v12 = vld [vmem:[#allocation2 + $0x38] sm:$0xff]  ;;  %v1779_v24 = vadd.f32 1.0, %v592_v39  ;;  %v751_v25 = vrot.slane %v750_v52, 4  ;;  %v863_v61 = vsel %vm289_vm0, %v855_v55, 0.0  ;;  %v1783_v59 = vsel %vm289_vm0, %v800_v50, 0.0 }
 0x21a   : > { %v571_v17 = vmul.f32 0.0010405828, %v563_v12  ;;  %v578_v36 = vsub.f32 %v570_v62, %v1562_v10  ;;  %v1786_v49 = vadd.f32 1.0, %v591_v20  ;;  %v1788_v18 = vadd.f32 1.0, %v593_v21 }
 0x21b   : > { %v752_v19 = vadd.f32 %v751_v25, %v750_v52  ;;  %v757_v40 = vsel %vm289_vm0, %v1777_v23, 0.0  ;;  %v766_v57 = vsel %vm289_vm0, %v1779_v24, 0.0  ;;  %v1796_v29 = vmul.f32 %v1687_v27, %v1777_v23 }
 0x21c   : > { %v579_v54 = vsub.f32 %v571_v17, %v1564_v11  ;;  %v586_v28 = vand.u32 2147483647, %v578_v36  ;;  %v758_v26 = vsel %vm289_vm0, %v1786_v49, 0.0  ;;  %v767_v35 = vsel %vm289_vm0, %v1788_v18, 0.0 }
 0x21d   : > { %v753_v37 = vrot.slane %v752_v19, 2  ;;  %v759_v30 = vadd.f32 %v758_v26, %v757_v40  ;;  %v768_v43 = vadd.f32 %v767_v35, %v766_v57  ;;  %v1805_v45 = vmul.f32 %v1699_v41, %v1786_v49 }
 0x21e   : > { %v587_v3 = vand.u32 2147483647, %v579_v54  ;;  %v594_v6 = vmul.f32 5.0, %v586_v28  ;;  %v1809_v27 = vmul.f32 %v1713_v58, %v1779_v24  ;;  %v1813_v46 = vmul.f32 %v1718_v16, %v1788_v18 }
 0x21f   : > { %v754_v47 = vadd.f32 %v753_v37, %v752_v19  ;;  %v760_v15 = vrot.slane %v759_v30, 4  ;;  %v769_v50 = vrot.slane %v768_v43, 4  ;;  %v856_v9 = vmul.f32 %v1796_v29, %v1548_v4 }
 0x220   : > { %v595_v13 = vmul.f32 5.0, %v587_v3  ;;  %v1817_v32 = vadd.f32 1.0, %v594_v6  ;;  %v857_v41 = vmul.f32 %v1805_v45, %v1550_v5  ;;  %v858_v58 = vmul.f32 %v1809_v27, %v1555_v7 }
 0x221   : > { %v755_v39 = vrot.slane %v754_v47, 1  ;;  %v761_v51 = vadd.f32 %v760_v15, %v759_v30  ;;  %v770_v16 = vadd.f32 %v769_v50, %v768_v43  ;;  %v859_v52 = vmul.f32 %v1813_v46, %v1557_v8 }
 0x222   : > { %v1825_v55 = vadd.f32 1.0, %v595_v13  ;;  %v775_v62 = vsel %vm289_vm0, %v1817_v32, 0.0  ;;  %v1831_v20 = vmul.f32 %v1723_v63, %v1817_v32  ;;  %v864_v21 = vadd.f32 %v863_v61, %v862_v56 }
 0x223   : > { %v756_v12 = vadd.f32 %v755_v39, %v754_v47  ;;  %v762_v25 = vrot.slane %v761_v51, 2  ;;  %v771_v17 = vrot.slane %v770_v16, 2  ;;  %v871_v36 = vsel %vm289_vm0, %v856_v9, 0.0 }
 0x224   : > { %v776_v19 = vsel %vm289_vm0, %v1825_v55, 0.0  ;;  %v1838_v40 = vmul.f32 %v1727_v60, %v1825_v55  ;;  %v860_v57 = vmul.f32 %v1831_v20, %v1562_v10  ;;  %v865_v54 = vrot.slane %v864_v21, 4 }
 0x225   : > { %v763_v28 = vadd.f32 %v762_v25, %v761_v51  ;;  %v772_v63 = vadd.f32 %v771_v17, %v770_v16  ;;  %v777_v26 = vadd.f32 %v776_v19, %v775_v62  ;;  %v872_v56 = vsel %vm289_vm0, %v857_v41, 0.0 }
 0x226   : > { %v861_v61 = vmul.f32 %v1838_v40, %v1564_v11  ;;  %v866_v35 = vadd.f32 %v865_v54, %v864_v21  ;;  %v873_v37 = vadd.f32 %v872_v56, %v871_v36  ;;  %v880_v30 = vsel %vm289_vm0, %v858_v58, 0.0 }
 0x227   : > { %v764_v43 = vrot.slane %v763_v28, 1  ;;  %v773_v3 = vrot.slane %v772_v63, 1  ;;  %v778_v60 = vrot.slane %v777_v26, 4  ;;  %v881_v6 = vsel %vm289_vm0, %v859_v52, 0.0 }
 0x228   : > { %v867_v47 = vrot.slane %v866_v35, 2  ;;  %v874_v15 = vrot.slane %v873_v37, 4  ;;  %v882_v50 = vadd.f32 %v881_v6, %v880_v30  ;;  %v889_v9 = vsel %vm289_vm0, %v860_v57, 0.0 }
 0x229   : > { %v765_v13 = vadd.f32 %v764_v43, %v763_v28  ;;  %v774_v41 = vadd.f32 %v773_v3, %v772_v63  ;;  %v779_v39 = vadd.f32 %v778_v60, %v777_v26  ;;  %v890_v51 = vsel %vm289_vm0, %v861_v61, 0.0 }
 0x22a   : > { %v868_v16 = vadd.f32 %v867_v47, %v866_v35  ;;  %v875_v62 = vadd.f32 %v874_v15, %v873_v37  ;;  %v883_v58 = vrot.slane %v882_v50, 4  ;;  %v891_v21 = vadd.f32 %v890_v51, %v889_v9 }
 0x22b   : > { %v780_v25 = vrot.slane %v779_v39, 2  ;;  %v789_v17 = vsel %vm788_vm10, %v765_v13, %v756_v12  ;;  %v801_v52 = vmul.f32 %v1730_v33, %v1777_v23  ;;  %v802_v36 = vmul.f32 %v1733_v42, %v1786_v49 }
 0x22c   : > { %v791_v19 = vsel %vm790_vm11, %v774_v41, %v789_v17  ;;  %v869_v57 = vrot.slane %v868_v16, 1  ;;  %v876_v54 = vrot.slane %v875_v62, 2  ;;  %v884_v28 = vadd.f32 %v883_v58, %v882_v50 }
 0x22d   : > { %v781_v63 = vadd.f32 %v780_v25, %v779_v39  ;;  %v892_v26 = vrot.slane %v891_v21, 4  ;;  %v803_v56 = vmul.f32 %v1736_v22, %v1779_v24  ;;  %v804_v61 = vmul.f32 %v1740_v14, %v1788_v18 }
 0x22e   : > { %v870_v12 = vadd.f32 %v869_v57, %v868_v16  ;;  %v877_v35 = vadd.f32 %v876_v54, %v875_v62  ;;  %v885_v37 = vrot.slane %v884_v28, 2  ;;  %v805_v33 = vmul.f32 %v1742_v53, %v1817_v32 }
 0x22f   : > { %v782_v42 = vrot.slane %v781_v63, 1  ;;  %v893_v30 = vadd.f32 %v892_v26, %v891_v21  ;;  %v806_v43 = vmul.f32 %v1744_v34, %v1825_v55  ;;  %v809_v3 = vadd.f32 %v1783_v59, %v1775_v0 }
 0x230   : > { %v878_v60 = vrot.slane %v877_v35, 1  ;;  %v886_v6 = vadd.f32 %v885_v37, %v884_v28  ;;  %v816_v22 = vsel %vm289_vm0, %v801_v52, 0.0  ;;  %v817_v14 = vsel %vm289_vm0, %v802_v36, 0.0 }
 0x231   : > { %v783_v47 = vadd.f32 %v782_v42, %v781_v63  ;;  %v894_v15 = vrot.slane %v893_v30, 2  ;;  %v810_v50 = vrot.slane %v809_v3, 4  ;;  %v818_v9 = vadd.f32 %v817_v14, %v816_v22 }
 0x232   : > { %v879_v13 = vadd.f32 %v878_v60, %v877_v35  ;;  %v887_v53 = vrot.slane %v886_v6, 1  ;;  %v825_v41 = vsel %vm289_vm0, %v803_v56, 0.0  ;;  %v826_v39 = vsel %vm289_vm0, %v804_v61, 0.0 }
 0x233   : > { %v793_v34 = vsel %vm792_vm12, %v783_v47, %v791_v19  ;;  %v895_v51 = vadd.f32 %v894_v15, %v893_v30  ;;  %v811_v0 = vadd.f32 %v810_v50, %v809_v3  ;;  %v819_v59 = vrot.slane %v818_v9, 4 }
 0x234   : > { %v796_v16 = vsel %vm795_vm13, %v793_v34, 0.0  ;;  %v888_v62 = vadd.f32 %v887_v53, %v886_v6  ;;  %v902_v58 = vsel %vm788_vm10, %v879_v13, %v870_v12  ;;  %v827_v21 = vadd.f32 %v826_v39, %v825_v41 }
 0x235   : > { %797 = vadd.xlane.f32.xlu1 %v796_v16  ;;  %v896_v25 = vrot.slane %v895_v51, 1  ;;  %v812_v17 = vrot.slane %v811_v0, 2  ;;  %v820_v52 = vadd.f32 %v819_v59, %v818_v9  ;;  %v834_v36 = vsel %vm289_vm0, %v805_v33, 0.0 }
 0x236   : > { %v903_v57 = vsel %vm790_vm11, %v888_v62, %v902_v58  ;;  %v828_v54 = vrot.slane %v827_v21, 4  ;;  %v835_v19 = vsel %vm289_vm0, %v806_v43, 0.0  ;;  %v740_v28 = vmul.f32 %v1738_v44, %v1542_v1 }
 0x237   : > { %v897_v63 = vadd.f32 %v896_v25, %v895_v51  ;;  %v813_v26 = vadd.f32 %v812_v17, %v811_v0  ;;  %v821_v56 = vrot.slane %v820_v52, 2  ;;  %v836_v61 = vadd.f32 %v835_v19, %v834_v36 }
 0x238   : > { %v829_v12 = vadd.f32 %v828_v54, %v827_v21  ;;  %v741_v35 = vmul.f32 %v1749_v31, %v1544_v2  ;;  %v742_v37 = vmul.f32 %v1777_v23, %v1548_v4  ;;  %v743_v33 = vmul.f32 %v1786_v49, %v1550_v5 }
 0x239   : > { %v904_v42 = vsel %vm792_vm12, %v897_v63, %v903_v57  ;;  %v814_v30 = vrot.slane %v813_v26, 1  ;;  %v822_v43 = vadd.f32 %v821_v56, %v820_v52  ;;  %v837_v3 = vrot.slane %v836_v61, 4 }
 0x23a   : > { %v906_v1 = vsel %vm795_vm13, %v904_v42, 0.0  ;;  %v830_v44 = vrot.slane %v829_v12, 2  ;;  %v744_v60 = vmul.f32 %v1779_v24, %v1555_v7  ;;  %v745_v2 = vmul.f32 %v1788_v18, %v1557_v8 }
 0x23b   : > { %907 = vadd.xlane.f32.xlu0 %v906_v1  ;;  %v815_v31 = vadd.f32 %v814_v30, %v813_v26  ;;  %v823_v4 = vrot.slane %v822_v43, 1  ;;  %v838_v23 = vadd.f32 %v837_v3, %v836_v61  ;;  %v746_v5 = vmul.f32 %v1817_v32, %v1562_v10 }
 0x23c   : > { %v831_v49 = vadd.f32 %v830_v44, %v829_v12  ;;  %v747_v6 = vmul.f32 %v1825_v55, %v1564_v11  ;;  %v909_v22 = vadd.f32 %v740_v28, %v1755_v38  ;;  %v910_v14 = vadd.f32 %v741_v35, %v1765_v48 }
 0x23d   : > { %v824_v47 = vadd.f32 %v823_v4, %v822_v43  ;;  %v839_v7 = vrot.slane %v838_v23, 2  ;;  %v911_v24 = vadd.f32 %v742_v37, %v1796_v29  ;;  %v912_v8 = vadd.f32 %v743_v33, %v1805_v45 }
 0x23e   : > { %v832_v18 = vrot.slane %v831_v49, 1  ;;  %v913_v15 = vadd.f32 %v744_v60, %v1809_v27  ;;  %v914_v50 = vadd.f32 %v745_v2, %v1813_v46  ;;  %v915_v10 = vadd.f32 %v746_v5, %v1831_v20 }
 0x23f   : > { %v840_v32 = vadd.f32 %v839_v7, %v838_v23  ;;  %v847_v11 = vsel %vm788_vm10, %v824_v47, %v815_v31  ;;  %v916_v38 = vadd.f32 %v747_v6, %v1838_v40  ;;  %v917_v48 = vsel %vm289_vm0, %v909_v22, 0.0 }
 0x240   : > { %v833_v55 = vadd.f32 %v832_v18, %v831_v49  ;;  %v918_v9 = vsel %vm289_vm0, %v910_v14, 0.0  ;;  %v926_v29 = vsel %vm289_vm0, %v911_v24, 0.0  ;;  %v927_v45 = vsel %vm289_vm0, %v912_v8, 0.0 }
 0x241   : > { %v841_v13 = vrot.slane %v840_v32, 1  ;;  %v919_v27 = vadd.f32 %v918_v9, %v917_v48  ;;  %v928_v53 = vadd.f32 %v927_v45, %v926_v29  ;;  %v935_v46 = vsel %vm289_vm0, %v913_v15, 0.0 }
 0x242   : > { %v936_v20 = vsel %vm289_vm0, %v914_v50, 0.0  ;;  %v944_v41 = vsel %vm289_vm0, %v915_v10, 0.0  ;;  %v945_v40 = vsel %vm289_vm0, %v916_v38, 0.0  ;;  %v848_v59 = vsel %vm790_vm11, %v833_v55, %v847_v11 }
 0x243   : > { %v842_v39 = vadd.f32 %v841_v13, %v840_v32  ;;  %v920_v34 = vrot.slane %v919_v27, 4  ;;  %v929_v51 = vrot.slane %v928_v53, 4  ;;  %v937_v0 = vadd.f32 %v936_v20, %v935_v46 }
 0x244   : > { %v946_v16 = vadd.f32 %v945_v40, %v944_v41 }
 0x245   : > { %v849_v62 = vsel %vm792_vm12, %v842_v39, %v848_v59  ;;  %v921_v58 = vadd.f32 %v920_v34, %v919_v27  ;;  %v930_v21 = vadd.f32 %v929_v51, %v928_v53  ;;  %v938_v25 = vrot.slane %v937_v0, 4 }
 0x246   : > { %v851_v17 = vsel %vm795_vm13, %v849_v62, 0.0  ;;  %v947_v52 = vrot.slane %v946_v16, 4 }
 0x247   : > { %852 = vadd.xlane.f32.xlu1 %v851_v17  ;;  %v922_v36 = vrot.slane %v921_v58, 2  ;;  %v931_v57 = vrot.slane %v930_v21, 2  ;;  %v939_v54 = vadd.f32 %v938_v25, %v937_v0 }
 0x248   : > { %v948_v19 = vadd.f32 %v947_v52, %v946_v16 }
 0x249   : > { %v923_v28 = vadd.f32 %v922_v36, %v921_v58  ;;  %v932_v63 = vadd.f32 %v931_v57, %v930_v21  ;;  %v940_v26 = vrot.slane %v939_v54, 2 }
 0x24a   : > { %v949_v56 = vrot.slane %v948_v19, 2 }
 0x24b   : > { %v924_v61 = vrot.slane %v923_v28, 1  ;;  %v933_v12 = vrot.slane %v932_v63, 1  ;;  %v941_v35 = vadd.f32 %v940_v26, %v939_v54 }
 0x24c   : > { %v950_v37 = vadd.f32 %v949_v56, %v948_v19 }
 0x24d   : > { %v925_v33 = vadd.f32 %v924_v61, %v923_v28  ;;  %v934_v42 = vadd.f32 %v933_v12, %v932_v63  ;;  %v942_v30 = vrot.slane %v941_v35, 1 }
 0x24e   : > { %v951_v43 = vrot.slane %v950_v37, 1 }
 0x24f   : > { %v943_v3 = vadd.f32 %v942_v30, %v941_v35  ;;  %v957_v1 = vsel %vm788_vm10, %v934_v42, %v925_v33 }
 0x250   : > { %v952_v44 = vadd.f32 %v951_v43, %v950_v37 }
 0x251   : > { %v958_v60 = vsel %vm790_vm11, %v943_v3, %v957_v1 }
 0x252   : > { %v959_v2 = vsel %vm792_vm12, %v952_v44, %v958_v60 }
 0x253   : > { %v961_v31 = vsel %vm795_vm13, %v959_v2, 0.0 }
 0x254   : > { %962 = vadd.xlane.f32.xlu0 %v961_v31 }
 0x2c2   : > { %v798_v5 = vpop.xlane.xlu1 %797 }
 0x2c3   : > { %1252 = vrcp.f32 %v798_v5 }
 0x2c8   : > { %v908_v4 = vpop.xlane.xlu0 %907 }
 0x2c9   : > { %v966_v14 = vadd.f32 1.0, %v908_v4 }
 0x2cd   : > { %v1253_v22 = vpop.eup %1252 }
 0x2d4   : > { %v853_v24 = vpop.xlane.xlu1 %852 }
 0x2d5   : > { %v965_v8 = vmul.f32 %v1253_v22, %v853_v24 }
 0x2e1   : > { %v963_v23 = vpop.xlane.xlu0 %962 }
 0x2e2   : > { %v967_v49 = vsub.f32 %v963_v23, %v908_v4 }
 0x2e4   : > { %v968_v6 = vadd.f32 1.0, %v967_v49 }
 0x2e6   : > { %1254 = vrcp.f32 %v968_v6 }
 0x2f0   : > { %v1255_v47 = vpop.eup %1254 }
 0x2f1   : > { %v970_v7 = vmul.f32 %v1255_v47, %v966_v14 }
 0x2f3   : > { %v971_v18 = vsub.f32 1.0, %v970_v7 }
 0x2f5   : > { %v972_v15 = vadd.f32 %v971_v18, %v965_v8 }
 0x2f7   : > { %v974_v50 = vsel %vm973_vm14, %v972_v15, 0.0 }
 0x2f8   : > { %975 = vadd.xlane.f32.xlu0 %v974_v50 }
 0x385   : > { %v976_v10 = vpop.xlane.xlu0 %975 }
 0x386   : > { %v977_v32 = vrot.slane %v976_v10, 4 }
 0x388   : > { %v978_v11 = vadd.f32 %v977_v32, %v976_v10 }
 0x38a   : > { %v979_v38 = vrot.slane %v978_v11, 2 }
 0x38c   : > { %v980_v48 = vadd.f32 %v979_v38, %v978_v11 }
 0x38e   : > { %v981_v55 = vrot.slane %v980_v48, 1 }
 0x390   : > { %v982_v9 = vadd.f32 %v981_v55, %v980_v48 }
 0x392   : > { %1152 = vpush %v982_v9 }
 0x3c3   : > { %s1153_s8 = spop %1152 }
 0x3c4   : > { %v984_v29 = vstv %s1153_s8 }
 0x3c5   : > { %985 = vst [vmem:[%s259_s27] sm:$0xff] %v984_v29 }
 0x3c6 PF: > { %p17_p11 = scmp.ge.s32.totalorder %s1409_s20, 4   ;;  %s1946_s15 = smov %s1346_s16 }
 0x3c7   : > { %s1947_s16 = smov %s1350_s17  ;;  %s1948_s17 = smov %s1419_s23 }
 0x3c8   : > { %s1949_s18 = smov %s1409_s20  ;;  %19 = sbr.rel (!%p17_p11) target bundleno = 5 (0x5), region = 92 }
 0x3cf   :  { %1005 = vsyncpa [#allocation4], 1 }
 0x3d0   :  { %1007 = vsyncpa [#allocation4 + $0x1], 1 }
 0x3d1   :  { %1008 = vsyncpa [#allocation6], 1 }
 0x3d2   :  { %1010 = vsyncpa [#allocation6 + $0x1], 1 }

</bundles_post_ra>
